<compile_context>
chip_gen: v7x
topology: tpu7x:2x2x1
jax: 0.10.0
libtpu: 0.0.40
codegen_flags: <defaults>
</compile_context>

<pallas_src>
import jax
import jax.numpy as jnp
from jax.experimental import pallas as pl
from jax.experimental.pallas import tpu as pltpu


def se_block_kernel(x_ref, p_ref, o_ref):
    # x_ref : (BT, C, HW) f32    -- BT batch elements per grid step
    # p_ref : (C+1, 2*Cm+1) f32  -- packed [w1 | w2 | b2 ; b1-row]
    # o_ref : (BT, C, HW) f32
    C = x_ref.shape[1]
    Cm = (p_ref.shape[1] - 1) // 2

    x = x_ref[...]                                      # (BT, C, HW)

    # ---- squeeze: global average pool over the spatial (lane) axis ----
    y = jnp.mean(x, axis=-1, keepdims=True)             # (BT, C, 1)

    # ---- unpack the (tiny) excitation parameters from the packed block ----
    w1 = p_ref[0:C, 0:Cm]                               # (C, Cm)  == fc1.weight.T
    b1 = p_ref[C:C + 1, 0:Cm]                           # (1, Cm)  == fc1.bias
    w2 = p_ref[0:C, Cm:2 * Cm]                          # (C, Cm)  == fc2.weight
    b2 = p_ref[0:C, 2 * Cm:2 * Cm + 1]                  # (C, 1)   == fc2.bias

    # ---- excitation MLP on the VPU/XLU (shapes far too small for the MXU) ----
    # fc1: h[b, m] = sum_c y[b, c] * w1[c, m] + b1[m]
    h = jnp.sum(y * w1[None], axis=1) + b1              # (BT, Cm)
    h = jnp.maximum(h, 0.0)                             # ReLU
    # fc2: s[b, c] = sum_m h[b, m] * w2[c, m] + b2[c]
    s = jnp.sum(h[:, None, :] * w2[None], axis=-1, keepdims=True) + b2[None]
    s = jax.nn.sigmoid(s)                               # (BT, C, 1) channel gates

    # ---- scale: broadcast channel gates over spatial positions ----
    o_ref[...] = x * s


@jax.jit
def se_block(x_nchw, w1, b1, w2, b2):
    """SEBlock forward.

    x_nchw: (B, C, H, W) f32
    w1    : (C, Cm)  (== PyTorch fc1.weight.T)
    b1    : (Cm,)    (== fc1.bias)
    w2    : (C, Cm)  (== PyTorch fc2.weight)
    b2    : (C,)     (== fc2.bias)
    """
    B, C, H, W = x_nchw.shape
    HW = H * W
    Cm = w1.shape[1]

    x = x_nchw.reshape(B, C, HW)

    # Pack all excitation parameters into one small block so the kernel sees a
    # single, step-invariant parameter DMA (constant index_map keeps it
    # VMEM-resident across grid steps).
    params = jnp.zeros((C + 1, 2 * Cm + 1), x.dtype)
    params = params.at[:C, :Cm].set(w1)
    params = params.at[C, :Cm].set(b1)
    params = params.at[:C, Cm:2 * Cm].set(w2)
    params = params.at[:C, 2 * Cm].set(b2)

    # Batch tile: target ~2 MiB per x block (double-buffered in+out stays well
    # under the scoped-VMEM budget), capped by B.  Per-batch-row math is
    # independent, so padded rows in a ragged final block are harmless
    # (their outputs are discarded by the masked write-back).
    bytes_per_batch = C * HW * x.dtype.itemsize
    bt = max(1, min(B, (2 * 1024 * 1024) // max(1, bytes_per_batch)))
    nb = pl.cdiv(B, bt)

    out = pl.pallas_call(
        se_block_kernel,
        out_shape=jax.ShapeDtypeStruct((B, C, HW), x.dtype),
        grid=(nb,),
        in_specs=[
            # Per-step batch tile; last dim (HW) is the lane axis.
            pl.BlockSpec((bt, C, HW), lambda b: (b, 0, 0)),
            # Packed params: constant index_map -> DMA'd once, stays resident.
            pl.BlockSpec((C + 1, 2 * Cm + 1), lambda b: (0, 0)),
        ],
        out_specs=pl.BlockSpec((bt, C, HW), lambda b: (b, 0, 0)),
        compiler_params=pltpu.CompilerParams(
            dimension_semantics=("parallel",),      # megacore split on v7x
            vmem_limit_bytes=32 * 1024 * 1024,      # portable across v5e/v6e/v7x
        ),
    )(x, params)
    return out.reshape(B, C, H, W)


if __name__ == "__main__":
    # Shapes consistent with SEBlock(in_channels=32, reduction=16).
    B, C, H, W = 2, 32, 16, 16
    reduction = 16
    Cm = C // reduction  # 2

    key = jax.random.PRNGKey(0)
    kx, k1, k2, k3, k4 = jax.random.split(key, 5)

    x = jax.random.normal(kx, (B, C, H, W), dtype=jnp.float32)

    # Deterministic parameter init. PyTorch Linear stores weight as (out, in);
    # we store fc1 transposed so both weight blocks are (C, Cm) and channels
    # stay on the sublane axis inside the kernel.
    bound1 = 1.0 / (C ** 0.5)
    w1 = jax.random.uniform(k1, (C, Cm), jnp.float32, -bound1, bound1)   # fc1.weight.T
    b1 = jax.random.uniform(k2, (Cm,), jnp.float32, -bound1, bound1)     # fc1.bias
    bound2 = 1.0 / (Cm ** 0.5)
    w2 = jax.random.uniform(k3, (C, Cm), jnp.float32, -bound2, bound2)   # fc2.weight
    b2 = jax.random.uniform(k4, (C,), jnp.float32, -bound2, bound2)      # fc2.bias

    # Pure-JAX reference.
    y_ref = jnp.mean(x, axis=(2, 3))                        # (B, C)
    h_ref = jnp.maximum(y_ref @ w1 + b1, 0.0)               # (B, Cm)
    s_ref = jax.nn.sigmoid(h_ref @ w2.T + b2)               # (B, C)
    ref = jax.block_until_ready(x * s_ref[:, :, None, None])

    out = jax.block_until_ready(se_block(x, w1, b1, w2, b2))

    assert out.shape == (B, C, H, W)
    assert jnp.allclose(out, ref, atol=1e-5, rtol=1e-5), "mismatch vs reference"

    print("KERNEL_OK")
</pallas_src>

<mosaic_0001>
module attributes {stable_mosaic.version = 11 : i64} {
  func.func @se_block_kernel(%arg0: i32, %arg1: memref<2x32x256xf32, #tpu.memory_space<vmem>>, %arg2: memref<33x5xf32, #tpu.memory_space<vmem>>, %arg3: memref<2x32x256xf32, #tpu.memory_space<vmem>>) attributes {dimension_semantics = [#tpu.dimension_semantics<parallel>], iteration_bounds = array<i64: 1>, scalar_prefetch = 0 : i64, scratch_operands = 0 : i64, tpu.core_type = #tpu.core_type<tc>, window_params = [{transform_indices = @transform_0, window_bounds = array<i64: 2, 32, 256>}, {pipeline_mode = #tpu.pipeline_mode<synchronous>, transform_indices = @transform_1, window_bounds = array<i64: 33, 5>}, {transform_indices = @transform_2, window_bounds = array<i64: 2, 32, 256>}]} {
    %c0 = arith.constant 0 : index
    %c0_0 = arith.constant 0 : index
    %c0_1 = arith.constant 0 : index
    %0 = vector.load %arg1[%c0, %c0_0, %c0_1] : memref<2x32x256xf32, #tpu.memory_space<vmem>>, vector<2x32x256xf32>
    %cst = arith.constant dense<0.000000e+00> : vector<2x32xf32>
    %1 = vector.multi_reduction <add>, %0, %cst [2] : vector<2x32x256xf32> to vector<2x32xf32>
    %2 = vector.shape_cast %1 : vector<2x32xf32> to vector<2x32x1xf32>
    %cst_2 = arith.constant 2.560000e+02 : f32
    %3 = vector.broadcast %cst_2 : f32 to vector<2x32x1xf32>
    %4 = arith.divf %2, %3 : vector<2x32x1xf32>
    %c0_3 = arith.constant 0 : index
    %c0_4 = arith.constant 0 : index
    %5 = vector.load %arg2[%c0_3, %c0_4] : memref<33x5xf32, #tpu.memory_space<vmem>>, vector<32x2xf32>
    %c32 = arith.constant 32 : index
    %c0_5 = arith.constant 0 : index
    %6 = vector.load %arg2[%c32, %c0_5] : memref<33x5xf32, #tpu.memory_space<vmem>>, vector<1x2xf32>
    %c0_6 = arith.constant 0 : index
    %c2 = arith.constant 2 : index
    %7 = vector.load %arg2[%c0_6, %c2] : memref<33x5xf32, #tpu.memory_space<vmem>>, vector<32x2xf32>
    %c0_7 = arith.constant 0 : index
    %c4 = arith.constant 4 : index
    %8 = vector.load %arg2[%c0_7, %c4] : memref<33x5xf32, #tpu.memory_space<vmem>>, vector<32x1xf32>
    %9 = vector.shape_cast %5 : vector<32x2xf32> to vector<1x32x2xf32>
    %10 = vector.broadcast %4 : vector<2x32x1xf32> to vector<2x32x2xf32>
    %11 = vector.broadcast %9 : vector<1x32x2xf32> to vector<2x32x2xf32>
    %12 = arith.mulf %10, %11 : vector<2x32x2xf32>
    %cst_8 = arith.constant dense<0.000000e+00> : vector<2x2xf32>
    %13 = vector.multi_reduction <add>, %12, %cst_8 [1] : vector<2x32x2xf32> to vector<2x2xf32>
    %14 = vector.broadcast %6 : vector<1x2xf32> to vector<2x2xf32>
    %15 = arith.addf %13, %14 : vector<2x2xf32>
    %cst_9 = arith.constant 0.000000e+00 : f32
    %16 = vector.broadcast %cst_9 : f32 to vector<2x2xf32>
    %17 = arith.maximumf %15, %16 : vector<2x2xf32>
    %18 = vector.shape_cast %17 : vector<2x2xf32> to vector<2x1x2xf32>
    %19 = vector.shape_cast %7 : vector<32x2xf32> to vector<1x32x2xf32>
    %20 = vector.broadcast %18 : vector<2x1x2xf32> to vector<2x32x2xf32>
    %21 = vector.broadcast %19 : vector<1x32x2xf32> to vector<2x32x2xf32>
    %22 = arith.mulf %20, %21 : vector<2x32x2xf32>
    %cst_10 = arith.constant dense<0.000000e+00> : vector<2x32xf32>
    %23 = vector.multi_reduction <add>, %22, %cst_10 [2] : vector<2x32x2xf32> to vector<2x32xf32>
    %24 = vector.shape_cast %23 : vector<2x32xf32> to vector<2x32x1xf32>
    %25 = vector.shape_cast %8 : vector<32x1xf32> to vector<1x32x1xf32>
    %26 = vector.broadcast %25 : vector<1x32x1xf32> to vector<2x32x1xf32>
    %27 = arith.addf %24, %26 : vector<2x32x1xf32>
    %28 = arith.negf %27 : vector<2x32x1xf32>
    %29 = math.exp %28 : vector<2x32x1xf32>
    %cst_11 = arith.constant 1.000000e+00 : f32
    %30 = vector.broadcast %cst_11 : f32 to vector<2x32x1xf32>
    %31 = arith.addf %30, %29 : vector<2x32x1xf32>
    %32 = arith.divf %30, %31 : vector<2x32x1xf32>
    %33 = vector.broadcast %32 : vector<2x32x1xf32> to vector<2x32x256xf32>
    %34 = arith.mulf %0, %33 : vector<2x32x256xf32>
    %c0_12 = arith.constant 0 : index
    %c0_13 = arith.constant 0 : index
    %c0_14 = arith.constant 0 : index
    %35 = vector.load %arg3[%c0_12, %c0_13, %c0_14] : memref<2x32x256xf32, #tpu.memory_space<vmem>>, vector<2x32x256xf32>
    tpu.vector_store %arg3[%c0_12, %c0_13, %c0_14], %34 {strides = array<i32>} : memref<2x32x256xf32, #tpu.memory_space<vmem>>, vector<2x32x256xf32>,
    return
  }
  func.func @transform_0(%arg0: i32) -> (i32, i32, i32) {
    %c0_i32 = arith.constant 0 : i32
    %c0_i32_0 = arith.constant 0 : i32
    %c0_i32_1 = arith.constant 0 : i32
    return %arg0, %c0_i32, %c0_i32_0 : i32, i32, i32
  }
  func.func @transform_1(%arg0: i32) -> (i32, i32) {
    %c0_i32 = arith.constant 0 : i32
    %c0_i32_0 = arith.constant 0 : i32
    %c0_i32_1 = arith.constant 0 : i32
    return %c0_i32, %c0_i32_0 : i32, i32
  }
  func.func @transform_2(%arg0: i32) -> (i32, i32, i32) {
    %c0_i32 = arith.constant 0 : i32
    %c0_i32_0 = arith.constant 0 : i32
    %c0_i32_1 = arith.constant 0 : i32
    return %arg0, %c0_i32, %c0_i32_0 : i32, i32, i32
  }
}

</mosaic_0001>

<bundles_post_ra>
// kernel: se_block.1
= control target key start
LH: loop header
LB: loop body
LE: loop exit
PB: predicated region body
PF: predicated region fallthrough
CT: control target
= control target key end

     0   :  { %s341_s15 = smov 126   ;;  %vm73_vm0 = vcmask 15360   ;;  %s577_s0 = inlined_call_operand.vmem [shape: f32[2,32,256], index: 0, kind: input, shape index: {}]   ;;  %s578_s1 = inlined_call_operand.vmem [shape: f32[33,5], index: 1, kind: input, shape index: {}]   ;;  %s579_s2 = inlined_call_operand.vmem [shape: f32[2,32,256], index: 2, kind: output, shape index: {}]  }
   0x1   :  { %v361_v0 = vld [vmem:[%s577_s0 + $0x40] sm:$0xff]  ;;  %v366_v1 = vld [vmem:[%s577_s0 + $0x48] sm:$0xff]  ;;  %v383_v5 = vld [vmem:[%s577_s0 + $0x50] sm:$0xff] }
   0x2   :  { %v371_v2 = vld [vmem:[%s577_s0] sm:$0xff]  ;;  %v39_v3 = vadd.f32 %v366_v1, %v361_v0  ;;  %v378_v4 = vld [vmem:[%s577_s0 + $0x8] sm:$0xff]  ;;  %v388_v6 = vld [vmem:[%s577_s0 + $0x58] sm:$0xff] }
   0x3   :  { %v27_v7 = vadd.f32 %v378_v4, %v371_v2  ;;  %v395_v8 = vld [vmem:[%s577_s0 + $0x10] sm:$0xff]  ;;  %v400_v9 = vld [vmem:[%s577_s0 + $0x18] sm:$0xff]  ;;  %v42_v10 = vadd.f32 %v388_v6, %v383_v5  ;;  %v409_v12 = vld [vmem:[%s577_s0 + $0x60] sm:$0xff] }
   0x4   :  { %40 = vadd.xlane.f32.xlu1 %v39_v3  ;;  %v30_v11 = vadd.f32 %v400_v9, %v395_v8  ;;  %v414_v13 = vld [vmem:[%s577_s0 + $0x68] sm:$0xff]  ;;  %v419_v14 = vld [vmem:[%s577_s0 + $0x20] sm:$0xff]  ;;  %v433_v18 = vld [vmem:[%s577_s0 + $0x70] sm:$0xff] }
   0x5   :  { %28 = vadd.xlane.f32.xlu0 %v27_v7  ;;  %v424_v15 = vld [vmem:[%s577_s0 + $0x28] sm:$0xff]  ;;  %v45_v16 = vadd.f32 %v414_v13, %v409_v12  ;;  %v438_v19 = vld [vmem:[%s577_s0 + $0x78] sm:$0xff]  ;;  %v443_v20 = vld [vmem:[%s577_s0 + $0x30] sm:$0xff] }
   0x6   :  { %v33_v17 = vadd.f32 %v424_v15, %v419_v14  ;;  %v448_v21 = vld [vmem:[%s577_s0 + $0x38] sm:$0xff]  ;;  %v48_v22 = vadd.f32 %v438_v19, %v433_v18  ;;  %v457_v24 = vld [vmem:[%s578_s1 + $0x8] sm:$0xff]  ;;  %v463_v25 = vld [vmem:[%s578_s1 + $0x10] sm:$0xff] }
   0x7   :  { %v36_v23 = vadd.f32 %v448_v21, %v443_v20  ;;  %v468_v26 = vld [vmem:[%s578_s1] sm:$0xff]  ;;  %v474_v27 = vld [vmem:[%s578_s1 + $0x18] sm:$0xff] }
   0x8   :  { %43 = vadd.xlane.f32.xlu1 %v42_v10 }
   0x9   :  { %31 = vadd.xlane.f32.xlu0 %v30_v11 }
   0xc   :  { %46 = vadd.xlane.f32.xlu1 %v45_v16 }
   0xd   :  { %34 = vadd.xlane.f32.xlu0 %v33_v17 }
  0x10   :  { %49 = vadd.xlane.f32.xlu1 %v48_v22 }
  0x11   :  { %37 = vadd.xlane.f32.xlu0 %v36_v23 }
  0x21   :  { %122 = vrot.lane.b32.xlu1 %v457_v24, %s341_s15 }
  0x25   :  { %124 = vrot.lane.b32.xlu1 %v463_v25, %s341_s15 }
  0x27   :  { %120 = vrot.lane.b32.xlu0 %v468_v26, %s341_s15 }
  0x29   :  { %126 = vrot.lane.b32.xlu1 %v474_v27, %s341_s15 }
  0x91   :  { %v41_v28 = vpop.xlane.xlu1 %40 }
  0x92   :  { %v56_v29 = vmul.f32 0.00390625, %v41_v28  ;;  %v29_v30 = vpop.xlane.xlu0 %28  ;;  %v108_v28 = vlaneseq }
  0x93   :  { %v52_v35 = vmul.f32 0.00390625, %v29_v30 }
  0x94   :  { %v69_v31 = vmul.f32 %v468_v26, %v56_v29 }
  0x95   :  { %v44_v32 = vpop.xlane.xlu1 %43  ;;  %v65_v44 = vmul.f32 %v468_v26, %v52_v35 }
  0x96   :  { %v57_v33 = vmul.f32 0.00390625, %v44_v32  ;;  %v32_v34 = vpop.xlane.xlu0 %31  ;;  %v87_v37 = vsel %vm73_vm0, %v69_v31, 0.0 }
  0x97   :  { %v53_v36 = vmul.f32 0.00390625, %v32_v34  ;;  %v74_v54 = vsel %vm73_vm0, %v65_v44, 0.0  ;;  %v109_v34 = vshrl.u32 %v108_v28, 7 }
  0x98   :  { %v70_v38 = vmul.f32 %v457_v24, %v57_v33  ;;  %v296_v33 = vld [vmem:[%s578_s1 + $0x20] ss:$0 sm:$0xff] }
  0x99   :  { %v66_v39 = vmul.f32 %v457_v24, %v53_v36  ;;  %v47_v40 = vpop.xlane.xlu1 %46 }
  0x9a   :  { %v88_v41 = vsel %vm73_vm0, %v70_v38, 0.0  ;;  %v58_v42 = vmul.f32 0.00390625, %v47_v40  ;;  %v35_v43 = vpop.xlane.xlu0 %34 }
  0x9b   :  { %v89_v45 = vadd.f32 %v88_v41, %v87_v37  ;;  %v54_v46 = vmul.f32 0.00390625, %v35_v43  ;;  %v75_v48 = vsel %vm73_vm0, %v66_v39, 0.0  ;;  %v110_v39 = vsub.s32 0, %v109_v34 }
  0x9c   :  { %v71_v47 = vmul.f32 %v463_v25, %v58_v42  ;;  %v76_v58 = vadd.f32 %v75_v48, %v74_v54 }
  0x9d   :  { %v67_v49 = vmul.f32 %v463_v25, %v54_v46  ;;  %v50_v50 = vpop.xlane.xlu1 %49 }
  0x9e   :  { %v90_v51 = vsel %vm73_vm0, %v71_v47, 0.0  ;;  %v59_v52 = vmul.f32 0.00390625, %v50_v50  ;;  %v38_v53 = vpop.xlane.xlu0 %37 }
  0x9f   :  { %v91_v55 = vadd.f32 %v90_v51, %v89_v45  ;;  %v77_v56 = vsel %vm73_vm0, %v67_v49, 0.0  ;;  %v55_v57 = vmul.f32 0.00390625, %v38_v53 }
  0xa0   :  { %v72_v59 = vmul.f32 %v474_v27, %v59_v52  ;;  %v78_v61 = vadd.f32 %v77_v56, %v76_v58 }
  0xa1   :  { %v68_v60 = vmul.f32 %v474_v27, %v55_v57  ;;  %v123_v36 = vpop.permute.xlu1 %122 }
  0xa2   :  { %v92_v62 = vsel %vm73_vm0, %v72_v59, 0.0  ;;  %v121_v44 = vpop.permute.xlu0 %120 }
  0xa3   :  { %v93_v63 = vadd.f32 %v92_v62, %v91_v55  ;;  %v79_v3 = vsel %vm73_vm0, %v68_v60, 0.0 }
  0xa4   :  { %v80_v7 = vadd.f32 %v79_v3, %v78_v61  ;;  %v342_v3 = vmov 4  }
  0xa5   :  { %v94_v10 = vrot.slane %v93_v63, 4  ;;  %v125_v43 = vpop.permute.xlu1 %124  ;;  %308 = vset.pattern.permute.xlu1 %v342_v3  ;;  %307 = vset.pattern.permute.xlu0 %v342_v3 }
  0xa6   :  { %v81_v11 = vrot.slane %v80_v7, 4 }
  0xa7   :  { %v95_v16 = vadd.f32 %v94_v10, %v93_v63 }
  0xa8   :  { %v82_v17 = vadd.f32 %v81_v11, %v80_v7 }
  0xa9   :  { %v96_v22 = vrot.slane %v95_v16, 2  ;;  %v127_v53 = vpop.permute.xlu1 %126 }
  0xaa   :  { %v83_v23 = vrot.slane %v82_v17, 2 }
  0xab   :  { %v97_v29 = vadd.f32 %v96_v22, %v95_v16 }
  0xac   :  { %v84_v30 = vadd.f32 %v83_v23, %v82_v17 }
  0xad   :  { %v98_v31 = vrot.slane %v97_v29, 1 }
  0xae   :  { %v85_v32 = vrot.slane %v84_v30, 1 }
  0xaf   :  { %v99_v35 = vadd.f32 %v98_v31, %v97_v29 }
  0xb0   :  { %v86_v37 = vadd.f32 %v85_v32, %v84_v30 }
  0xb1   :  { %v105_v38 = vadd.f32 %v296_v33, %v99_v35 }
  0xb2   :  { %v104_v40 = vadd.f32 %v296_v33, %v86_v37 }
  0xb3   :  { %v107_v41 = vmax.f32 %v105_v38, 0.0 }
  0xb4   :  { %v106_v42 = vmax.f32 %v104_v40, 0.0 }
  0xb5   :  { %v115_v45 = vrot.slane %v107_v41, %v110_v39 }
  0xb6   :  { %v111_v46 = vrot.slane %v106_v42, %v110_v39 }
  0xb7   :  { %v137_v49 = vmul.f32 %v123_v36, %v115_v45  ;;  %v139_v55 = vmul.f32 %v127_v53, %v115_v45  ;;  %v136_v58 = vmul.f32 %v121_v44, %v115_v45  ;;  %v138_v61 = vmul.f32 %v125_v43, %v115_v45 }
  0xb8   :  { %v133_v47 = vmul.f32 %v123_v36, %v111_v46  ;;  %v132_v48 = vmul.f32 %v121_v44, %v111_v46  ;;  %v134_v50 = vmul.f32 %v125_v43, %v111_v46  ;;  %v135_v54 = vmul.f32 %v127_v53, %v111_v46 }
  0xb9   :  { %v155_v56 = vsel %vm73_vm0, %v137_v49, 0.0  ;;  %v161_v59 = vsel %vm73_vm0, %v139_v55, 0.0  ;;  %v152_v62 = vsel %vm73_vm0, %v136_v58, 0.0  ;;  %v158_v63 = vsel %vm73_vm0, %v138_v61, 0.0 }
  0xba   :  { %v143_v51 = vsel %vm73_vm0, %v133_v47, 0.0  ;;  %v140_v52 = vsel %vm73_vm0, %v132_v48, 0.0  ;;  %v146_v57 = vsel %vm73_vm0, %v134_v50, 0.0  ;;  %v149_v60 = vsel %vm73_vm0, %v135_v54, 0.0 }
  0xbb   :  { %144 = vadd.xlane.f32.xlu1 %v143_v51  ;;  %141 = vadd.xlane.f32.xlu0 %v140_v52 }
  0xbf   :  { %156 = vadd.xlane.f32.xlu1 %v155_v56  ;;  %147 = vadd.xlane.f32.xlu0 %v146_v57 }
  0xc3   :  { %162 = vadd.xlane.f32.xlu1 %v161_v59  ;;  %150 = vadd.xlane.f32.xlu0 %v149_v60 }
  0xc7   :  { %153 = vadd.xlane.f32.xlu0 %v152_v62 }
  0xcb   :  { %159 = vadd.xlane.f32.xlu0 %v158_v63 }
 0x148   :  { %v145_v7 = vpop.xlane.xlu1 %144  ;;  %v142_v10 = vpop.xlane.xlu0 %141 }
 0x149   :  { %v165_v11 = vadd.f32 %v145_v7, %v457_v24  ;;  %v164_v16 = vadd.f32 %v142_v10, %v468_v26 }
 0x14b   :  { %v298_v17 = vmul.f32 -1.442695, %v165_v11  ;;  %v297_v22 = vmul.f32 -1.442695, %v164_v16 }
 0x14c   :  { %v148_v23 = vpop.xlane.xlu0 %147  ;;  %v157_v28 = vpop.xlane.xlu1 %156 }
 0x14d   :  { %309 = vpow2.f32 %v298_v17  ;;  %v166_v29 = vadd.f32 %v148_v23, %v463_v25  ;;  %v169_v31 = vadd.f32 %v157_v28, %v457_v24 }
 0x14e   :  { %311 = vpow2.f32 %v297_v22 }
 0x14f   :  { %v299_v30 = vmul.f32 -1.442695, %v166_v29  ;;  %v302_v35 = vmul.f32 -1.442695, %v169_v31 }
 0x150   :  { %v151_v32 = vpop.xlane.xlu0 %150  ;;  %v163_v39 = vpop.xlane.xlu1 %162 }
 0x151   :  { %v167_v33 = vadd.f32 %v151_v32, %v474_v27  ;;  %313 = vpow2.f32 %v299_v30  ;;  %v171_v45 = vadd.f32 %v163_v39, %v474_v27 }
 0x153   :  { %v300_v34 = vmul.f32 -1.442695, %v167_v33 }
 0x154   :  { %v154_v36 = vpop.xlane.xlu0 %153 }
 0x155   :  { %v168_v37 = vadd.f32 %v154_v36, %v468_v26  ;;  %315 = vpow2.f32 %v300_v34  ;;  %v304_v26 = vmul.f32 -1.442695, %v171_v45 }
 0x156   :  { %317 = vpow2.f32 %v302_v35 }
 0x157   :  { %v310_v38 = vpop.eup %309  ;;  %v301_v40 = vmul.f32 -1.442695, %v168_v37 }
 0x158   :  { %v312_v41 = vpop.eup %311  ;;  %v197_v42 = vadd.f32 1.0, %v310_v38  ;;  %v160_v43 = vpop.xlane.xlu0 %159 }
 0x159   :  { %v196_v44 = vadd.f32 1.0, %v312_v41  ;;  %319 = vpow2.f32 %v301_v40  ;;  %v170_v24 = vadd.f32 %v160_v43, %v463_v25 }
 0x15a   :  { %321 = vrcp.f32 %v197_v42 }
 0x15b   :  { %323 = vrcp.f32 %v196_v44  ;;  %v303_v46 = vmul.f32 -1.442695, %v170_v24  ;;  %v314_v47 = vpop.eup %313 }
 0x15c   :  { %v198_v48 = vadd.f32 1.0, %v314_v47 }
 0x15d   :  { %325 = vpow2.f32 %v303_v46 }
 0x15e   :  { %327 = vrcp.f32 %v198_v48 }
 0x15f   :  { %v316_v49 = vpop.eup %315  ;;  %329 = vpow2.f32 %v304_v26 }
 0x160   :  { %v199_v50 = vadd.f32 1.0, %v316_v49  ;;  %v318_v51 = vpop.eup %317 }
 0x161   :  { %v201_v25 = vadd.f32 1.0, %v318_v51 }
 0x162   :  { %331 = vrcp.f32 %v199_v50 }
 0x163   :  { %v320_v52 = vpop.eup %319 }
 0x164   :  { %v322_v53 = vpop.eup %321  ;;  %v200_v54 = vadd.f32 1.0, %v320_v52 }
 0x165   :  { %v324_v55 = vpop.eup %323  ;;  %227 = vperm.xlu1 %308, %v322_v53  }
 0x166   :  { %333 = vrcp.f32 %v200_v54  ;;  %222 = vperm.xlu0 %307, %v324_v55  }
 0x167   :  { %v326_v27 = vpop.eup %325  ;;  %335 = vrcp.f32 %v201_v25 }
 0x168   :  { %v328_v56 = vpop.eup %327  ;;  %v202_v57 = vadd.f32 1.0, %v326_v27 }
 0x169   :  { %232 = vperm.xlu1 %308, %v328_v56   ;;  %v330_v58 = vpop.eup %329 }
 0x16a   :  { %v203_v60 = vadd.f32 1.0, %v330_v58  ;;  %337 = vrcp.f32 %v202_v57 }
 0x16c   :  { %v332_v59 = vpop.eup %331  ;;  %339 = vrcp.f32 %v203_v60 }
 0x16d   :  { %237 = vperm.xlu1 %308, %v332_v59  }
 0x170   :  { %v334_v61 = vpop.eup %333 }
 0x171   :  { %242 = vperm.xlu1 %308, %v334_v61   ;;  %v336_v62 = vpop.eup %335 }
 0x174   :  { %v338_v63 = vpop.eup %337 }
 0x175   :  { %247 = vperm.xlu1 %308, %v336_v62  }
 0x176   :  { %v340_v3 = vpop.eup %339 }
 0x179   :  { %252 = vperm.xlu1 %308, %v338_v63  }
 0x17d   :  { %257 = vperm.xlu1 %308, %v340_v3  }
 0x1e4   :  { %v228_v7 = vpop.permute.xlu1 %227 }
 0x1e5   :  { %v262_v10 = vmul.f32 %v228_v7, %v395_v8  ;;  %v263_v11 = vmul.f32 %v228_v7, %v400_v9  ;;  %v223_v16 = vpop.permute.xlu0 %222 }
 0x1e6   :  { %v260_v17 = vmul.f32 %v223_v16, %v371_v2  ;;  %v261_v22 = vmul.f32 %v223_v16, %v378_v4 }
 0x1e7   :  { %278 = vst [vmem:[%s579_s2 + $0x10] sm:$0xff] %v262_v10  ;;  %279 = vst [vmem:[%s579_s2 + $0x18] sm:$0xff] %v263_v11 }
 0x1e8   :  { %276 = vst [vmem:[%s579_s2] sm:$0xff] %v260_v17  ;;  %277 = vst [vmem:[%s579_s2 + $0x8] sm:$0xff] %v261_v22  ;;  %v233_v8 = vpop.permute.xlu1 %232 }
 0x1e9   :  { %v264_v2 = vmul.f32 %v233_v8, %v419_v14  ;;  %v265_v4 = vmul.f32 %v233_v8, %v424_v15 }
 0x1eb   :  { %280 = vst [vmem:[%s579_s2 + $0x20] sm:$0xff] %v264_v2  ;;  %281 = vst [vmem:[%s579_s2 + $0x28] sm:$0xff] %v265_v4 }
 0x1ec   :  { %v238_v9 = vpop.permute.xlu1 %237 }
 0x1ed   :  { %v266_v23 = vmul.f32 %v238_v9, %v443_v20  ;;  %v267_v28 = vmul.f32 %v238_v9, %v448_v21 }
 0x1ef   :  { %282 = vst [vmem:[%s579_s2 + $0x30] sm:$0xff] %v266_v23  ;;  %283 = vst [vmem:[%s579_s2 + $0x38] sm:$0xff] %v267_v28 }
 0x1f0   :  { %v243_v14 = vpop.permute.xlu1 %242 }
 0x1f1   :  { %v268_v15 = vmul.f32 %v243_v14, %v361_v0  ;;  %v269_v29 = vmul.f32 %v243_v14, %v366_v1 }
 0x1f3   :  { %284 = vst [vmem:[%s579_s2 + $0x40] sm:$0xff] %v268_v15  ;;  %285 = vst [vmem:[%s579_s2 + $0x48] sm:$0xff] %v269_v29 }
 0x1f4   :  { %v248_v20 = vpop.permute.xlu1 %247 }
 0x1f5   :  { %v270_v21 = vmul.f32 %v248_v20, %v383_v5  ;;  %v271_v30 = vmul.f32 %v248_v20, %v388_v6 }
 0x1f7   :  { %286 = vst [vmem:[%s579_s2 + $0x50] sm:$0xff] %v270_v21  ;;  %287 = vst [vmem:[%s579_s2 + $0x58] sm:$0xff] %v271_v30 }
 0x1f8   :  { %v253_v0 = vpop.permute.xlu1 %252 }
 0x1f9   :  { %v272_v1 = vmul.f32 %v253_v0, %v409_v12  ;;  %v273_v31 = vmul.f32 %v253_v0, %v414_v13 }
 0x1fb   :  { %288 = vst [vmem:[%s579_s2 + $0x60] sm:$0xff] %v272_v1  ;;  %289 = vst [vmem:[%s579_s2 + $0x68] sm:$0xff] %v273_v31 }
 0x1fc   :  { %v258_v5 = vpop.permute.xlu1 %257 }
 0x1fd   :  { %v274_v6 = vmul.f32 %v258_v5, %v433_v18  ;;  %v275_v32 = vmul.f32 %v258_v5, %v438_v19 }
 0x1ff   :  { %290 = vst [vmem:[%s579_s2 + $0x70] sm:$0xff] %v274_v6  ;;  %291 = vst [vmem:[%s579_s2 + $0x78] sm:$0xff] %v275_v32 }

</bundles_post_ra>
